<compile_context>
chip_gen: v6e
topology: v6e:2x2x1
jax: 0.10.0
libtpu: 0.0.40
codegen_flags: <defaults>
</compile_context>

<pallas_src>
import functools
import math

import numpy as np
import jax
import jax.numpy as jnp
from jax.experimental import pallas as pl
from jax.experimental.pallas import tpu as pltpu


def _gcn_at_kernel(x_ref, wq_ref, wk_ref, b_ref, th_ref, o_ref,
                   *, N, T, F, S, H, dk):
    """One batch per grid point: attention adjacency + GCN + relu + concat + residual."""
    x = x_ref[0]                                                    # (N, T*F)

    # Time-pooled features for the attention adjacency (computed in-kernel,
    # no extra input stream). At T == 1 this is a no-op.
    if T == 1:
        xm = x                                                      # (N, F)
    else:
        xm = jnp.mean(x.reshape(N, T, F), axis=1)                   # (N, F)

    # Q / K at full width F (one matmul each for all heads).
    q = jnp.dot(xm, wq_ref[...], preferred_element_type=jnp.float32) + b_ref[0:1, :]
    k = jnp.dot(xm, wk_ref[...], preferred_element_type=jnp.float32) + b_ref[1:2, :]

    inv_sqrt_dk = 1.0 / math.sqrt(dk)
    head_outs = []
    for h in range(H):                                              # static unroll
        qh = q[:, h * dk:(h + 1) * dk]                              # (N, dk)
        kh = k[:, h * dk:(h + 1) * dk]                              # (N, dk)
        scores = jax.lax.dot_general(qh, kh, (((1,), (1,)), ((), ())),
                                     preferred_element_type=jnp.float32)
        scores = scores * inv_sqrt_dk                               # (N, N)
        scores = scores - jnp.max(scores, axis=-1, keepdims=True)
        e = jnp.exp(scores)
        denom = jnp.sum(e, axis=-1, keepdims=True)
        attn = e * pl.reciprocal(denom, approx=True)                # (N, N)

        # GCN spatial aggregation: A @ X_t for every t, fused as one (N,N)x(N,T*F).
        agg = jnp.dot(attn, x, preferred_element_type=jnp.float32)  # (N, T*F)

        # relu(agg @ Theta_h): contract the feature axis per time step.
        if T == 1:
            yh = jnp.dot(agg, th_ref[h],
                         preferred_element_type=jnp.float32)        # (N, S)
        else:
            yh = jax.lax.dot_general(agg.reshape(N, T, F), th_ref[h],
                                     (((2,), (0,)), ((), ())),
                                     preferred_element_type=jnp.float32)
            yh = yh.reshape(N, T * S)
        head_outs.append(jnp.maximum(yh, 0.0))                      # (N, T*S)

    # torch.cat(gcn_out_list, dim=2): head-major along the timestep axis.
    y = head_outs[0] if H == 1 else jnp.concatenate(head_outs, axis=-1)  # (N, H*T*S)

    # Fused residual `final + X` (PyTorch broadcast; valid when S == F and
    # (T == 1 or H == 1), so X's time index coincides with t in both cases).
    res = x if H == 1 else jnp.concatenate([x] * H, axis=-1)        # (N, H*T*F)
    o_ref[0] = y + res


def init_params(key, d_model, spatial_channels, heads):
    """Deterministic parameter init mirroring the PyTorch module's shapes/inits."""
    assert d_model % heads == 0
    kq, kbq, kk, kbk, kth = jax.random.split(key, 5)
    lin_std = 1.0 / math.sqrt(d_model)                # nn.Linear default-style
    th_std = 1.0 / math.sqrt(spatial_channels)        # GCN.reset_parameters
    Wq = jax.random.uniform(kq, (d_model, d_model), jnp.float32, -lin_std, lin_std)
    bq = jax.random.uniform(kbq, (d_model,), jnp.float32, -lin_std, lin_std)
    Wk = jax.random.uniform(kk, (d_model, d_model), jnp.float32, -lin_std, lin_std)
    bk = jax.random.uniform(kbk, (d_model,), jnp.float32, -lin_std, lin_std)
    Theta = jax.random.uniform(kth, (heads, d_model, spatial_channels),
                               jnp.float32, -th_std, th_std)
    return dict(Wq=Wq, bq=bq, Wk=Wk, bk=bk, Theta=Theta,
                heads=heads, spatial_channels=spatial_channels)


def gcn_at_forward(X, params):
    B, N, T, F = X.shape
    H = params["heads"]
    S = params["spatial_channels"]
    assert F % H == 0, "d_model must be divisible by the number of heads"
    dk = F // H
    # The torch module's `cat(dim=2) + X` only broadcasts for these configs.
    assert S == F and (T == 1 or H == 1), \
        "residual requires spatial_channels == d_model and (heads == 1 or T == 1)"

    Xf = X.reshape(B, N, T * F)                         # free metadata reshape
    biases = jnp.stack([params["bq"], params["bk"]], axis=0)   # (2, F)

    kernel = functools.partial(_gcn_at_kernel, N=N, T=T, F=F, S=S, H=H, dk=dk)
    out = pl.pallas_call(
        kernel,
        out_shape=jax.ShapeDtypeStruct((B, N, H * T * S), jnp.float32),
        grid_spec=pltpu.PrefetchScalarGridSpec(
            num_scalar_prefetch=0,
            grid=(B,),
            in_specs=[
                pl.BlockSpec((1, N, T * F), lambda b: (b, 0, 0)),   # X (flattened)
                pl.BlockSpec((F, F), lambda b: (0, 0)),             # Wq (resident)
                pl.BlockSpec((F, F), lambda b: (0, 0)),             # Wk (resident)
                pl.BlockSpec((2, F), lambda b: (0, 0)),             # [bq; bk]
                pl.BlockSpec((H, F, S), lambda b: (0, 0, 0)),       # Theta (resident)
            ],
            out_specs=pl.BlockSpec((1, N, H * T * S), lambda b: (b, 0, 0)),
        ),
        compiler_params=pltpu.CompilerParams(
            dimension_semantics=("parallel",)),
    )(Xf, params["Wq"], params["Wk"], biases, params["Theta"])

    # Contiguous reshape only (concat + residual already done in-kernel).
    return out.reshape(B, N, H * T, S)


def gcn_at_reference(X, params):
    """Pure-JAX reference with identical semantics (for correctness check)."""
    B, N, T, F = X.shape
    heads = params["heads"]
    dk = F // heads
    Xm = jnp.mean(X, axis=2)
    q = Xm @ params["Wq"] + params["bq"]
    k = Xm @ params["Wk"] + params["bk"]
    q = q.reshape(B, N, heads, dk).transpose(0, 2, 1, 3)
    k = k.reshape(B, N, heads, dk).transpose(0, 2, 1, 3)
    scores = jnp.einsum("bhnd,bhmd->bhnm", q, k) / math.sqrt(dk)
    attn = jax.nn.softmax(scores, axis=-1)
    outs = []
    for h in range(heads):
        agg = jnp.einsum("bnm,bmtf->bntf", attn[:, h], X)
        y = jax.nn.relu(jnp.einsum("bntf,fs->bnts", agg, params["Theta"][h]))
        outs.append(y)
    final = jnp.concatenate(outs, axis=2)
    return final + X


if __name__ == "__main__":
    # Shapes: for the torch code's `cat(dim=2) + X` to be well defined we need
    # (heads == 1) or (num_timesteps == 1), and spatial_channels == d_model.
    B, N, T = 2, 8, 1
    d_model = 32
    spatial_channels = 32
    ag_head = 4

    key = jax.random.PRNGKey(0)
    kx, kp = jax.random.split(key)
    X = jax.random.normal(kx, (B, N, T, d_model), jnp.float32)
    params = init_params(kp, d_model, spatial_channels, ag_head)

    out = jax.block_until_ready(gcn_at_forward(X, params))
    assert out.shape == (B, N, ag_head * T, spatial_channels)

    ref = jax.block_until_ready(gcn_at_reference(X, params))
    np.testing.assert_allclose(np.asarray(out), np.asarray(ref),
                               atol=2e-2, rtol=2e-2)
    print("KERNEL_OK")
</pallas_src>

<mosaic_0001>
module attributes {stable_mosaic.version = 11 : i64} {
  func.func @_gcn_at_kernel(%arg0: i32, %arg1: memref<1x8x32xf32, #tpu.memory_space<vmem>>, %arg2: memref<32x32xf32, #tpu.memory_space<vmem>>, %arg3: memref<32x32xf32, #tpu.memory_space<vmem>>, %arg4: memref<2x32xf32, #tpu.memory_space<vmem>>, %arg5: memref<4x32x32xf32, #tpu.memory_space<vmem>>, %arg6: memref<1x8x128xf32, #tpu.memory_space<vmem>>) attributes {dimension_semantics = [#tpu.dimension_semantics<parallel>], iteration_bounds = array<i64: 2>, scalar_prefetch = 0 : i64, scratch_operands = 0 : i64, tpu.core_type = #tpu.core_type<tc>, window_params = [{transform_indices = @transform_0, window_bounds = array<i64: 1, 8, 32>}, {pipeline_mode = #tpu.pipeline_mode<synchronous>, transform_indices = @transform_1, window_bounds = array<i64: 32, 32>}, {pipeline_mode = #tpu.pipeline_mode<synchronous>, transform_indices = @transform_2, window_bounds = array<i64: 32, 32>}, {pipeline_mode = #tpu.pipeline_mode<synchronous>, transform_indices = @transform_3, window_bounds = array<i64: 2, 32>}, {pipeline_mode = #tpu.pipeline_mode<synchronous>, transform_indices = @transform_4, window_bounds = array<i64: 4, 32, 32>}, {transform_indices = @transform_5, window_bounds = array<i64: 1, 8, 128>}]} {
    %c0 = arith.constant 0 : index
    %c0_0 = arith.constant 0 : index
    %c0_1 = arith.constant 0 : index
    %0 = vector.load %arg1[%c0, %c0_0, %c0_1] : memref<1x8x32xf32, #tpu.memory_space<vmem>>, vector<1x8x32xf32>
    %1 = vector.shape_cast %0 : vector<1x8x32xf32> to vector<8x32xf32>
    %c0_2 = arith.constant 0 : index
    %c0_3 = arith.constant 0 : index
    %2 = vector.load %arg2[%c0_2, %c0_3] : memref<32x32xf32, #tpu.memory_space<vmem>>, vector<32x32xf32>
    %cst = arith.constant dense<0.000000e+00> : vector<8x32xf32>
    %3 = tpu.matmul %1, %2, %cst {dimension_numbers = #tpu.dot_dimension_numbers<[1], [0], [0], [1], [0, 0, 1, 1], [], []>} : vector<8x32xf32>, vector<32x32xf32>, vector<8x32xf32> -> vector<8x32xf32>
    %c0_4 = arith.constant 0 : index
    %c0_5 = arith.constant 0 : index
    %4 = vector.load %arg4[%c0_4, %c0_5] : memref<2x32xf32, #tpu.memory_space<vmem>>, vector<1x32xf32>
    %5 = vector.broadcast %4 : vector<1x32xf32> to vector<8x32xf32>
    %6 = arith.addf %3, %5 : vector<8x32xf32>
    %c0_6 = arith.constant 0 : index
    %c0_7 = arith.constant 0 : index
    %7 = vector.load %arg3[%c0_6, %c0_7] : memref<32x32xf32, #tpu.memory_space<vmem>>, vector<32x32xf32>
    %cst_8 = arith.constant dense<0.000000e+00> : vector<8x32xf32>
    %8 = tpu.matmul %1, %7, %cst_8 {dimension_numbers = #tpu.dot_dimension_numbers<[1], [0], [0], [1], [0, 0, 1, 1], [], []>} : vector<8x32xf32>, vector<32x32xf32>, vector<8x32xf32> -> vector<8x32xf32>
    %c1 = arith.constant 1 : index
    %c0_9 = arith.constant 0 : index
    %9 = vector.load %arg4[%c1, %c0_9] : memref<2x32xf32, #tpu.memory_space<vmem>>, vector<1x32xf32>
    %10 = vector.broadcast %9 : vector<1x32xf32> to vector<8x32xf32>
    %11 = arith.addf %8, %10 : vector<8x32xf32>
    %12 = vector.extract_strided_slice %6 {offsets = [0, 0], sizes = [8, 8], strides = [1, 1]} : vector<8x32xf32> to vector<8x8xf32>
    %13 = vector.extract_strided_slice %11 {offsets = [0, 0], sizes = [8, 8], strides = [1, 1]} : vector<8x32xf32> to vector<8x8xf32>
    %cst_10 = arith.constant dense<0.000000e+00> : vector<8x8xf32>
    %14 = tpu.matmul %12, %13, %cst_10 {dimension_numbers = #tpu.dot_dimension_numbers<[1], [1], [0], [0], [0, 0, 1, 0], [], []>} : vector<8x8xf32>, vector<8x8xf32>, vector<8x8xf32> -> vector<8x8xf32>
    %cst_11 = arith.constant 0.353553385 : f32
    %15 = vector.broadcast %cst_11 : f32 to vector<8x8xf32>
    %16 = arith.mulf %14, %15 : vector<8x8xf32>
    %cst_12 = arith.constant dense<0xFF800000> : vector<8xf32>
    %17 = vector.multi_reduction <maximumf>, %16, %cst_12 [1] : vector<8x8xf32> to vector<8xf32>
    %18 = vector.shape_cast %17 : vector<8xf32> to vector<8x1xf32>
    %19 = vector.broadcast %18 : vector<8x1xf32> to vector<8x8xf32>
    %20 = arith.subf %16, %19 : vector<8x8xf32>
    %21 = math.exp %20 : vector<8x8xf32>
    %cst_13 = arith.constant dense<0.000000e+00> : vector<8xf32>
    %22 = vector.multi_reduction <add>, %21, %cst_13 [1] : vector<8x8xf32> to vector<8xf32>
    %23 = vector.shape_cast %22 : vector<8xf32> to vector<8x1xf32>
    %24 = tpu.reciprocal %23 {approx = true} : vector<8x1xf32> -> vector<8x1xf32>
    %25 = vector.broadcast %24 : vector<8x1xf32> to vector<8x8xf32>
    %26 = arith.mulf %21, %25 : vector<8x8xf32>
    %cst_14 = arith.constant dense<0.000000e+00> : vector<8x32xf32>
    %27 = tpu.matmul %26, %1, %cst_14 {dimension_numbers = #tpu.dot_dimension_numbers<[1], [0], [0], [1], [0, 0, 1, 1], [], []>} : vector<8x8xf32>, vector<8x32xf32>, vector<8x32xf32> -> vector<8x32xf32>
    %c0_15 = arith.constant 0 : index
    %c0_16 = arith.constant 0 : index
    %c0_17 = arith.constant 0 : index
    %28 = vector.load %arg5[%c0_15, %c0_16, %c0_17] : memref<4x32x32xf32, #tpu.memory_space<vmem>>, vector<1x32x32xf32>
    %29 = vector.shape_cast %28 : vector<1x32x32xf32> to vector<32x32xf32>
    %cst_18 = arith.constant dense<0.000000e+00> : vector<8x32xf32>
    %30 = tpu.matmul %27, %29, %cst_18 {dimension_numbers = #tpu.dot_dimension_numbers<[1], [0], [0], [1], [0, 0, 1, 1], [], []>} : vector<8x32xf32>, vector<32x32xf32>, vector<8x32xf32> -> vector<8x32xf32>
    %cst_19 = arith.constant 0.000000e+00 : f32
    %31 = vector.broadcast %cst_19 : f32 to vector<8x32xf32>
    %32 = arith.maximumf %30, %31 : vector<8x32xf32>
    %33 = vector.extract_strided_slice %6 {offsets = [0, 8], sizes = [8, 8], strides = [1, 1]} : vector<8x32xf32> to vector<8x8xf32>
    %34 = vector.extract_strided_slice %11 {offsets = [0, 8], sizes = [8, 8], strides = [1, 1]} : vector<8x32xf32> to vector<8x8xf32>
    %cst_20 = arith.constant dense<0.000000e+00> : vector<8x8xf32>
    %35 = tpu.matmul %33, %34, %cst_20 {dimension_numbers = #tpu.dot_dimension_numbers<[1], [1], [0], [0], [0, 0, 1, 0], [], []>} : vector<8x8xf32>, vector<8x8xf32>, vector<8x8xf32> -> vector<8x8xf32>
    %cst_21 = arith.constant 0.353553385 : f32
    %36 = vector.broadcast %cst_21 : f32 to vector<8x8xf32>
    %37 = arith.mulf %35, %36 : vector<8x8xf32>
    %cst_22 = arith.constant dense<0xFF800000> : vector<8xf32>
    %38 = vector.multi_reduction <maximumf>, %37, %cst_22 [1] : vector<8x8xf32> to vector<8xf32>
    %39 = vector.shape_cast %38 : vector<8xf32> to vector<8x1xf32>
    %40 = vector.broadcast %39 : vector<8x1xf32> to vector<8x8xf32>
    %41 = arith.subf %37, %40 : vector<8x8xf32>
    %42 = math.exp %41 : vector<8x8xf32>
    %cst_23 = arith.constant dense<0.000000e+00> : vector<8xf32>
    %43 = vector.multi_reduction <add>, %42, %cst_23 [1] : vector<8x8xf32> to vector<8xf32>
    %44 = vector.shape_cast %43 : vector<8xf32> to vector<8x1xf32>
    %45 = tpu.reciprocal %44 {approx = true} : vector<8x1xf32> -> vector<8x1xf32>
    %46 = vector.broadcast %45 : vector<8x1xf32> to vector<8x8xf32>
    %47 = arith.mulf %42, %46 : vector<8x8xf32>
    %cst_24 = arith.constant dense<0.000000e+00> : vector<8x32xf32>
    %48 = tpu.matmul %47, %1, %cst_24 {dimension_numbers = #tpu.dot_dimension_numbers<[1], [0], [0], [1], [0, 0, 1, 1], [], []>} : vector<8x8xf32>, vector<8x32xf32>, vector<8x32xf32> -> vector<8x32xf32>
    %c1_25 = arith.constant 1 : index
    %c0_26 = arith.constant 0 : index
    %c0_27 = arith.constant 0 : index
    %49 = vector.load %arg5[%c1_25, %c0_26, %c0_27] : memref<4x32x32xf32, #tpu.memory_space<vmem>>, vector<1x32x32xf32>
    %50 = vector.shape_cast %49 : vector<1x32x32xf32> to vector<32x32xf32>
    %cst_28 = arith.constant dense<0.000000e+00> : vector<8x32xf32>
    %51 = tpu.matmul %48, %50, %cst_28 {dimension_numbers = #tpu.dot_dimension_numbers<[1], [0], [0], [1], [0, 0, 1, 1], [], []>} : vector<8x32xf32>, vector<32x32xf32>, vector<8x32xf32> -> vector<8x32xf32>
    %cst_29 = arith.constant 0.000000e+00 : f32
    %52 = vector.broadcast %cst_29 : f32 to vector<8x32xf32>
    %53 = arith.maximumf %51, %52 : vector<8x32xf32>
    %54 = vector.extract_strided_slice %6 {offsets = [0, 16], sizes = [8, 8], strides = [1, 1]} : vector<8x32xf32> to vector<8x8xf32>
    %55 = vector.extract_strided_slice %11 {offsets = [0, 16], sizes = [8, 8], strides = [1, 1]} : vector<8x32xf32> to vector<8x8xf32>
    %cst_30 = arith.constant dense<0.000000e+00> : vector<8x8xf32>
    %56 = tpu.matmul %54, %55, %cst_30 {dimension_numbers = #tpu.dot_dimension_numbers<[1], [1], [0], [0], [0, 0, 1, 0], [], []>} : vector<8x8xf32>, vector<8x8xf32>, vector<8x8xf32> -> vector<8x8xf32>
    %cst_31 = arith.constant 0.353553385 : f32
    %57 = vector.broadcast %cst_31 : f32 to vector<8x8xf32>
    %58 = arith.mulf %56, %57 : vector<8x8xf32>
    %cst_32 = arith.constant dense<0xFF800000> : vector<8xf32>
    %59 = vector.multi_reduction <maximumf>, %58, %cst_32 [1] : vector<8x8xf32> to vector<8xf32>
    %60 = vector.shape_cast %59 : vector<8xf32> to vector<8x1xf32>
    %61 = vector.broadcast %60 : vector<8x1xf32> to vector<8x8xf32>
    %62 = arith.subf %58, %61 : vector<8x8xf32>
    %63 = math.exp %62 : vector<8x8xf32>
    %cst_33 = arith.constant dense<0.000000e+00> : vector<8xf32>
    %64 = vector.multi_reduction <add>, %63, %cst_33 [1] : vector<8x8xf32> to vector<8xf32>
    %65 = vector.shape_cast %64 : vector<8xf32> to vector<8x1xf32>
    %66 = tpu.reciprocal %65 {approx = true} : vector<8x1xf32> -> vector<8x1xf32>
    %67 = vector.broadcast %66 : vector<8x1xf32> to vector<8x8xf32>
    %68 = arith.mulf %63, %67 : vector<8x8xf32>
    %cst_34 = arith.constant dense<0.000000e+00> : vector<8x32xf32>
    %69 = tpu.matmul %68, %1, %cst_34 {dimension_numbers = #tpu.dot_dimension_numbers<[1], [0], [0], [1], [0, 0, 1, 1], [], []>} : vector<8x8xf32>, vector<8x32xf32>, vector<8x32xf32> -> vector<8x32xf32>
    %c2 = arith.constant 2 : index
    %c0_35 = arith.constant 0 : index
    %c0_36 = arith.constant 0 : index
    %70 = vector.load %arg5[%c2, %c0_35, %c0_36] : memref<4x32x32xf32, #tpu.memory_space<vmem>>, vector<1x32x32xf32>
    %71 = vector.shape_cast %70 : vector<1x32x32xf32> to vector<32x32xf32>
    %cst_37 = arith.constant dense<0.000000e+00> : vector<8x32xf32>
    %72 = tpu.matmul %69, %71, %cst_37 {dimension_numbers = #tpu.dot_dimension_numbers<[1], [0], [0], [1], [0, 0, 1, 1], [], []>} : vector<8x32xf32>, vector<32x32xf32>, vector<8x32xf32> -> vector<8x32xf32>
    %cst_38 = arith.constant 0.000000e+00 : f32
    %73 = vector.broadcast %cst_38 : f32 to vector<8x32xf32>
    %74 = arith.maximumf %72, %73 : vector<8x32xf32>
    %75 = vector.extract_strided_slice %6 {offsets = [0, 24], sizes = [8, 8], strides = [1, 1]} : vector<8x32xf32> to vector<8x8xf32>
    %76 = vector.extract_strided_slice %11 {offsets = [0, 24], sizes = [8, 8], strides = [1, 1]} : vector<8x32xf32> to vector<8x8xf32>
    %cst_39 = arith.constant dense<0.000000e+00> : vector<8x8xf32>
    %77 = tpu.matmul %75, %76, %cst_39 {dimension_numbers = #tpu.dot_dimension_numbers<[1], [1], [0], [0], [0, 0, 1, 0], [], []>} : vector<8x8xf32>, vector<8x8xf32>, vector<8x8xf32> -> vector<8x8xf32>
    %cst_40 = arith.constant 0.353553385 : f32
    %78 = vector.broadcast %cst_40 : f32 to vector<8x8xf32>
    %79 = arith.mulf %77, %78 : vector<8x8xf32>
    %cst_41 = arith.constant dense<0xFF800000> : vector<8xf32>
    %80 = vector.multi_reduction <maximumf>, %79, %cst_41 [1] : vector<8x8xf32> to vector<8xf32>
    %81 = vector.shape_cast %80 : vector<8xf32> to vector<8x1xf32>
    %82 = vector.broadcast %81 : vector<8x1xf32> to vector<8x8xf32>
    %83 = arith.subf %79, %82 : vector<8x8xf32>
    %84 = math.exp %83 : vector<8x8xf32>
    %cst_42 = arith.constant dense<0.000000e+00> : vector<8xf32>
    %85 = vector.multi_reduction <add>, %84, %cst_42 [1] : vector<8x8xf32> to vector<8xf32>
    %86 = vector.shape_cast %85 : vector<8xf32> to vector<8x1xf32>
    %87 = tpu.reciprocal %86 {approx = true} : vector<8x1xf32> -> vector<8x1xf32>
    %88 = vector.broadcast %87 : vector<8x1xf32> to vector<8x8xf32>
    %89 = arith.mulf %84, %88 : vector<8x8xf32>
    %cst_43 = arith.constant dense<0.000000e+00> : vector<8x32xf32>
    %90 = tpu.matmul %89, %1, %cst_43 {dimension_numbers = #tpu.dot_dimension_numbers<[1], [0], [0], [1], [0, 0, 1, 1], [], []>} : vector<8x8xf32>, vector<8x32xf32>, vector<8x32xf32> -> vector<8x32xf32>
    %c3 = arith.constant 3 : index
    %c0_44 = arith.constant 0 : index
    %c0_45 = arith.constant 0 : index
    %91 = vector.load %arg5[%c3, %c0_44, %c0_45] : memref<4x32x32xf32, #tpu.memory_space<vmem>>, vector<1x32x32xf32>
    %92 = vector.shape_cast %91 : vector<1x32x32xf32> to vector<32x32xf32>
    %cst_46 = arith.constant dense<0.000000e+00> : vector<8x32xf32>
    %93 = tpu.matmul %90, %92, %cst_46 {dimension_numbers = #tpu.dot_dimension_numbers<[1], [0], [0], [1], [0, 0, 1, 1], [], []>} : vector<8x32xf32>, vector<32x32xf32>, vector<8x32xf32> -> vector<8x32xf32>
    %cst_47 = arith.constant 0.000000e+00 : f32
    %94 = vector.broadcast %cst_47 : f32 to vector<8x32xf32>
    %95 = arith.maximumf %93, %94 : vector<8x32xf32>
    %96 = tpu.concatenate %32, %53, %74, %95 in 1 : vector<8x32xf32>, vector<8x32xf32>, vector<8x32xf32>, vector<8x32xf32> -> vector<8x128xf32>
    %97 = tpu.concatenate %1, %1, %1, %1 in 1 : vector<8x32xf32>, vector<8x32xf32>, vector<8x32xf32>, vector<8x32xf32> -> vector<8x128xf32>
    %98 = arith.addf %96, %97 : vector<8x128xf32>
    %c0_48 = arith.constant 0 : index
    %c0_49 = arith.constant 0 : index
    %c0_50 = arith.constant 0 : index
    %99 = vector.load %arg6[%c0_48, %c0_49, %c0_50] : memref<1x8x128xf32, #tpu.memory_space<vmem>>, vector<1x8x128xf32>
    %100 = vector.shape_cast %99 : vector<1x8x128xf32> to vector<8x128xf32>
    %101 = vector.shape_cast %98 : vector<8x128xf32> to vector<1x8x128xf32>
    tpu.vector_store %arg6[%c0_48, %c0_49, %c0_50], %101 {strides = array<i32>} : memref<1x8x128xf32, #tpu.memory_space<vmem>>, vector<1x8x128xf32>,
    return
  }
  func.func @transform_0(%arg0: i32) -> (i32, i32, i32) {
    %c0_i32 = arith.constant 0 : i32
    %c0_i32_0 = arith.constant 0 : i32
    %c0_i32_1 = arith.constant 0 : i32
    return %arg0, %c0_i32, %c0_i32_0 : i32, i32, i32
  }
  func.func @transform_1(%arg0: i32) -> (i32, i32) {
    %c0_i32 = arith.constant 0 : i32
    %c0_i32_0 = arith.constant 0 : i32
    %c0_i32_1 = arith.constant 0 : i32
    return %c0_i32, %c0_i32_0 : i32, i32
  }
  func.func @transform_2(%arg0: i32) -> (i32, i32) {
    %c0_i32 = arith.constant 0 : i32
    %c0_i32_0 = arith.constant 0 : i32
    %c0_i32_1 = arith.constant 0 : i32
    return %c0_i32, %c0_i32_0 : i32, i32
  }
  func.func @transform_3(%arg0: i32) -> (i32, i32) {
    %c0_i32 = arith.constant 0 : i32
    %c0_i32_0 = arith.constant 0 : i32
    %c0_i32_1 = arith.constant 0 : i32
    return %c0_i32, %c0_i32_0 : i32, i32
  }
  func.func @transform_4(%arg0: i32) -> (i32, i32, i32) {
    %c0_i32 = arith.constant 0 : i32
    %c0_i32_0 = arith.constant 0 : i32
    %c0_i32_1 = arith.constant 0 : i32
    %c0_i32_2 = arith.constant 0 : i32
    return %c0_i32, %c0_i32_0, %c0_i32_1 : i32, i32, i32
  }
  func.func @transform_5(%arg0: i32) -> (i32, i32, i32) {
    %c0_i32 = arith.constant 0 : i32
    %c0_i32_0 = arith.constant 0 : i32
    %c0_i32_1 = arith.constant 0 : i32
    return %arg0, %c0_i32, %c0_i32_0 : i32, i32, i32
  }
}

</mosaic_0001>

<bundles_post_ra>
// kernel: tpu_custom_call.1
= control target key start
LH: loop header
LB: loop body
LE: loop exit
PB: predicated region body
PF: predicated region fallthrough
CT: control target
= control target key end

     0   :  { %10 = vsyncpa [#allocation3], 0  ;;  %s2382_s0 = inlined_call_operand.hbm [shape: f32[2,8,32], index: 0, kind: input, shape index: {}]   ;;  %s2383_s1 = inlined_call_operand.hbm [shape: f32[32,32], index: 1, kind: input, shape index: {}]   ;;  %s2384_s2 = inlined_call_operand.hbm [shape: f32[32,32], index: 2, kind: input, shape index: {}]   ;;  %s2385_s3 = inlined_call_operand.vmem [shape: f32[2,32], index: 3, kind: input, shape index: {}]   ;;  %s2386_s4 = inlined_call_operand.hbm [shape: f32[4,32,32], index: 4, kind: input, shape index: {}]   ;;  %s2387_s5 = inlined_call_operand.hbm [shape: f32[2,8,128], index: 5, kind: output, shape index: {}]  }
   0x1   :  { %12 = vsyncpa [#allocation3 + $0x1], 0 }
   0x2   :  { %13 = vsyncpa [#allocation6], 0 }
   0x3   :  { %14 = vsyncpa [#allocation9], 0 }
   0x4   :  { %15 = vsyncpa [#allocation4], 0 }
   0x5   :  { %17 = vsyncpa [#allocation4 + $0x1], 0  ;;  %s2075_s18 = smov 0   ;;  %s2077_s19 = smov 0  }
   0x6   :  { %s2079_s20 = smov 0   ;;  %s2081_s21 = smov 0  }
   0x7 LB: > { %s2096_s22 = sadd.s32 4294967295, %s2028_s21   ;;  %s1557_s23 = sadd.s32 4294967294, %s2028_s21   ;;  %s2028_s21 = sphi %s2081_s21, %s2411_s21   ;;  %s2024_s20 = sphi %s2079_s20, %s2410_s20   ;;  %s2020_s19 = sphi %s2077_s19, %s2409_s19   ;;  %s2016_s18 = sphi %s2075_s18, %s2408_s18  }
   0x8   : > { %p43_p0 = scmp.ne.s32.totalorder %s2020_s19, %s2016_s18  ;;  %p2388_p1 = scmp.eq.s32.totalorder %s2096_s22, 0 }
   0x9   : > { %p157_p3 = scmp.eq.s32.totalorder %s1557_s23, 1  ;;  %p1558_p5 = scmp.ge.s32.totalorder %s2028_s21, 1 }
   0xa   : > { %p2105_p4 = por %p2388_p1, %p43_p0  ;;  %p164_p7 = scmp.lt.s32.totalorder %s2028_s21, 3 }
   0xb   : > { %p2110_p6 = por %p157_p3, %p43_p0  ;;  %s2030_s27 = smov [#allocation5]  }
   0xc   : > { %s2392_s24 = scalar_select %p2105_p4, 1, 0 }
   0xd   : > { %s2393_s25 = scalar_select %p2110_p6, 1, 0 }
   0xe   : > { %p2115_p8 = pnand %p1558_p5, %p164_p7  ;;  %s176_s28 = sshll.u32 %s2030_s27, 4  ;;  %s177_s28 = int_to_ptr.vmem [resolvable:$true] %s176_s28 }
   0xf   : > { %s2031_s30 = smov [#allocation7]   ;;  %s2032_s7 = smov [#allocation8]  }
  0x10   : > { %s2394_s26 = scalar_select %p2115_p8, 1, 0 }
  0x11   : > { %p1763_p9 = pneg %p2115_p8  ;;  %s189_s6 = sshll.u32 %s2031_s30, 4  ;;  %s190_s6 = int_to_ptr.vmem [resolvable:$true] %s189_s6 }
  0x12   : > { %s205_s8 = sshll.u32 %s2032_s7, 4  ;;  %s1861_s9 = scalar_lea.vmem %s177_s28, 512  ;;  %s206_s8 = int_to_ptr.vmem [resolvable:$true] %s205_s8 }
  0x13   : > { %p2124_p11 = pnand %p1763_p9, %p2388_p1  ;;  %p1862_p13 = scmp.ne.s32.totalorder %s177_s28, %s1861_s9 }
  0x14   : > { %p1869_p5 = scmp.lt.s32.totalorder %s177_s28, %s177_s28  ;;  %p1870_p7 = scmp.lt.s32.totalorder %s1861_s9, %s1861_s9 }
  0x15   : > { %p1852_p12 = pneg %p2124_p11 }
  0x16   : > { %p1871_p9 = por %p1870_p7, %p1869_p5 }
  0x17   : > { %p1864_p0 = pnand %p1862_p13, %p1852_p12 }
  0x19   : > { %p1865_p3 = pneg %p1864_p0 }
  0x1b   : > { %p1872_p10 = pnand %p1871_p9, %p1865_p3 }
  0x1d   : > { %1875 = shalt.err (!%p1872_p10)
}
  0x1e   : > { %s2033_s10 = smov 128   ;;  %s2034_s11 = smov 8  }
  0x1f   : > { %1766 = dma.hbm_to_vmem [thread:$0]  (!%p2124_p11), %s2383_s1, 512, %s177_s28, [#allocation6], %s2033_s10, %s2033_s10, %s2034_s11  }
  0x20   : > { %s1887_s14 = scalar_lea.vmem %s190_s6, 512  ;;  %p1895_p2 = scmp.lt.s32.totalorder %s190_s6, %s190_s6 }
  0x21   : > { %p1888_p1 = scmp.ne.s32.totalorder %s190_s6, %s1887_s14  ;;  %p1896_p6 = scmp.lt.s32.totalorder %s1887_s14, %s1887_s14 }
  0x23   : > { %p1890_p13 = pnand %p1888_p1, %p1852_p12  ;;  %p1897_p5 = por %p1896_p6, %p1895_p2 }
  0x25   : > { %p1891_p0 = pneg %p1890_p13 }
  0x27   : > { %p1898_p3 = pnand %p1897_p5, %p1891_p0 }
  0x29   : > { %1901 = shalt.err (!%p1898_p3)
}
  0x2a   : > { %1769 = dma.hbm_to_vmem [thread:$0]  (!%p2124_p11), %s2384_s2, 512, %s190_s6, [#allocation6], %s2033_s10, %s2033_s10, %s2034_s11  }
  0x2b   : > { %s1913_s17 = scalar_lea.vmem %s206_s8, 2048  ;;  %p1921_p9 = scmp.lt.s32.totalorder %s206_s8, %s206_s8 }
  0x2c   : > { %p1914_p10 = scmp.ne.s32.totalorder %s206_s8, %s1913_s17  ;;  %p1922_p13 = scmp.lt.s32.totalorder %s1913_s17, %s1913_s17 }
  0x2e   : > { %p1916_p7 = pnand %p1914_p10, %p1852_p12  ;;  %p1923_p4 = por %p1922_p13, %p1921_p9 }
  0x30   : > { %p1917_p1 = pneg %p1916_p7 }
  0x32   : > { %p1924_p2 = pnand %p1923_p4, %p1917_p1 }
  0x34   : > { %1927 = shalt.err (!%p1924_p2)
}
  0x35   : > { %1772 = dma.hbm_to_vmem [thread:$0]  (!%p2124_p11), %s2386_s4, 2048, %s206_s8, [#allocation9], %s2033_s10, %s2033_s10, %s2034_s11  }
  0x36   : > { %s2155_s28 = sadd.s32 1, %s2028_s21   ;;  %s30_s29 = sadd.s32 1, %s2024_s20 }
  0x37   : > { %s27_s30 = ssub.s32 %s2028_s21, %s2155_s28  ;;  %p37_p6 = scmp.ne.s32.totalorder %s2024_s20, %s2020_s19 }
  0x38   : > { %p28_p4 = scmp.eq.s32.totalorder %s27_s30, 0  ;;  %p38_p12 = scmp.eq.s32.totalorder %s2028_s21, 0 }
  0x39   : > { %p1784_p0 = scmp.lt.s32.totalorder %s2028_s21, 2  ;;  %p2396_p3 = scmp.eq.s32.totalorder %s2096_s22, 1 }
  0x3a   : > { %s2165_s6 = scalar_select %p28_p4, %s2024_s20, %s30_s29  }
  0x3b   : > { %p39_p5 = por %p38_p12, %p37_p6  ;;  %p2169_p10 = por %p2396_p3, %p37_p6 }
  0x3c   : > { %s219_s9 = sand.u32 1, %s2024_s20   ;;  %s1564_s12 = sshll.u32 %s2028_s21, 7 }
  0x3d   : > { %s2397_s7 = scalar_select %p2169_p10, 1, 0 }
  0x3e   : > { %s1563_s8 = sshll.u32 %s219_s9, 3  ;;  %s2178_s13 = scalar_lea.hbm %s2382_s0, %s1564_s12 }
  0x3f   : > { %s223_s14 = scalar_lea.vmem [#allocation2], %s1563_s8  ;;  %p2180_p11 = pnand %p1784_p0, %p39_p5 }
  0x40   : > { %s230_s15 = sshll.u32 %s223_s14, 4  ;;  %s220_s17 = scalar_lea.sflag [#allocation3], %s219_s9  ;;  %s231_s15 = int_to_ptr.vmem [resolvable:$true] %s230_s15 }
  0x41   : > { %s1928_s23 = scalar_lea.hbm %s2178_s13, 128  ;;  %p1930_p1 = pneg %p2180_p11 }
  0x42   : > { %p1929_p7 = scmp.ne.s32.totalorder %s2178_s13, %s1928_s23  ;;  %s1933_s29 = scalar_lea.hbm %s2382_s0, 256 }
  0x43   : > { %p1934_p2 = scmp.lt.s32.totalorder %s2178_s13, %s2382_s0  ;;  %p1935_p4 = scmp.lt.s32.totalorder %s1933_s29, %s1928_s23 }
  0x44   : > { %p1931_p9 = pnand %p1930_p1, %p1929_p7 }
  0x45   : > { %p1936_p6 = por %p1935_p4, %p1934_p2 }
  0x46   : > { %p1932_p13 = pneg %p1931_p9 }
  0x48   : > { %p1937_p12 = pnand %p1936_p6, %p1932_p13 }
  0x4a   : > { %1940 = shalt.err (!%p1937_p12)
}
  0x4b   : > { %s1941_s10 = scalar_lea.vmem %s231_s15, 128  ;;  %s2035_s9 = smov [#allocation2]  }
  0x4c   : > { %p1942_p0 = scmp.ne.s32.totalorder %s231_s15, %s1941_s10  ;;  %s1946_s11 = sshll.u32 %s2035_s9, 4  ;;  %s1947_s11 = int_to_ptr.vmem [resolvable:$false] %s1946_s11 }
  0x4d   : > { %s1948_s14 = scalar_lea.vmem %s1947_s11, 256  ;;  %p1949_p7 = scmp.lt.s32.totalorder %s231_s15, %s1947_s11 }
  0x4e   : > { %p1944_p5 = pnand %p1942_p0, %p1930_p1  ;;  %p1950_p9 = scmp.lt.s32.totalorder %s1948_s14, %s1941_s10 }
  0x50   : > { %p1945_p3 = pneg %p1944_p5  ;;  %p1951_p10 = por %p1950_p9, %p1949_p7 }
  0x52   : > { %p1952_p8 = pnand %p1951_p10, %p1945_p3 }
  0x54   : > { %1955 = shalt.err (!%p1952_p8)
}
  0x55   : > { %1776 = dma.hbm_to_vmem [thread:$0]  (!%p2180_p11), %s2178_s13, 128, %s231_s15, %s220_s17  }
  0x56   : > { %p2399_p13 = scmp.ne.s32.totalorder %s2394_s26, 0 }
  0x57   : > { %s2201_s23 = sand.u32 (!%p2399_p13), 1, %s2020_s19   ;;  %p2400_p8 = scmp.ne.s32.totalorder (!%p2399_p13), %s2392_s24, 0 }
  0x58   : > { %239 = sbr.rel (%p2399_p13) target bundleno = 2867 (0xb33), region = 40  ;;  %s1566_s27 = sshll.u32 (!%p2399_p13), %s2201_s23, 3 }
  0x59   : > { %s242_s30 = scalar_lea.sflag (!%p2399_p13), [#allocation3], %s2201_s23  ;;  %s2207_s29 = scalar_lea.vmem (!%p2399_p13), [#allocation2], %s1566_s27 }
  0x5d   : > { %1999 = dma.done.wait (%p2400_p8), %s242_s30, 128  }
  0x5e   : > { %2001 = vsyncadd (%p2400_p8), %s242_s30, 4294967168  ;;  %p2401_p10 = scmp.eq.s32.totalorder %s2096_s22, 0 }
  0x60   : > { %2003 = dma.done.wait (%p2401_p10), [#allocation6], 1024   ;;  %p2402_p11 = pmov %p2401_p10 }
  0x61   : > { %p2403_p1 = pmov %p2401_p10 }
  0x62   : > { %2005 = vsyncadd (%p2402_p11), [#allocation6], 4294966272 }
  0x63   : > { %2007 = dma.done.wait (%p2403_p1), [#allocation9], 2048   ;;  %p2404_p2 = pmov %p2403_p1 }
  0x64   : > { %v2036_v0 = vmov 0.0   ;;  %vm2037_vm0 = vmmov 0   ;;  %v371_v1 = vld [vmem:[#allocation7 + $0x18] sm:$0xff]  ;;  %v370_v3 = vld [vmem:[#allocation7 + $0x10] sm:$0xff]  ;;  %v369_v5 = vld [vmem:[#allocation7 + $0x8] sm:$0xff]  ;;  %vm294_vm1 = vcmask 261120  }
  0x65   : > { %2009 = vsyncadd (%p2404_p2), [#allocation9], 4294965248  ;;  %1652 = vmatprep.subr.mxu1 %v2036_v0  ;;  %1641 = vmatprep.subr.mxu0 %v2036_v0  ;;  %v288_v2 = vld [vmem:[#allocation5 + $0x18] sm:$0xff]  ;;  %v287_v4 = vld [vmem:[#allocation5 + $0x10] sm:$0xff]  ;;  %vm447_vm2 = vcmask 64512   ;;  %s2038_s16 = smov 120  }
  0x66   : > { %1660 = vmatprep.mubr.msk.f32.mxu1 %vm2037_vm0, %v2036_v0  ;;  %1649 = vmatprep.mubr.msk.f32.mxu0 %vm2037_vm0, %v2036_v0  ;;  %v286_v6 = vld [vmem:[#allocation5 + $0x8] sm:$0xff]  ;;  %v368_v7 = vld [vmem:[#allocation7] sm:$0xff]  ;;  %v2232_v9 = vld [vmem:[%s2207_s29] sm:$0xff]  ;;  %s2039_s17 = smov 112   ;;  %s2040_s12 = smov 104   ;;  %vm1426_vm3 = vcmask 523264  }
  0x67   : > { %1653 = vmatpush3.msra.mxu1 %v371_v1  ;;  %1642 = vmatpush3.msra.mxu0 %v288_v2  ;;  %v285_v8 = vld [vmem:[#allocation5] sm:$0xff]  ;;  %v1573_v10 = vld [vmem:[%s2385_s3 + $0x1] ss:$0 sm:$0xff]  ;;  %v1571_v11 = vld [vmem:[%s2385_s3] ss:$0 sm:$0xff]  ;;  %s2041_s8 = smov 32  }
  0x68   : > { %1654 = vmatprep.subr.mxu1 %v2036_v0  ;;  %1643 = vmatprep.subr.mxu0 %v2036_v0  ;;  %v612_v27 = vld [vmem:[#allocation8 + $0x18] sm:$0xff]  ;;  %v611_v28 = vld [vmem:[#allocation8 + $0x10] sm:$0xff]  ;;  %v610_v29 = vld [vmem:[#allocation8 + $0x8] sm:$0xff]  ;;  %s2042_s10 = smov 64   ;;  %s2043_s9 = smov 96   ;;  %vm1428_vm4 = vcmask 785408  }
  0x69   : > { %1655 = vmatpush3.msra.mxu1 %v370_v3  ;;  %1644 = vmatpush3.msra.mxu0 %v287_v4  ;;  %v609_v35 = vld [vmem:[#allocation8] sm:$0xff]  ;;  %v854_v49 = vld [vmem:[#allocation8 + $0x38] sm:$0xff]  ;;  %v853_v50 = vld [vmem:[#allocation8 + $0x30] sm:$0xff]  ;;  %s1592_s11 = sshll.u32 %s2096_s22, 7  ;;  %s283_s14 = scalar_lea.vmem [#allocation10], %s1566_s27 }
  0x6a   : > { %1656 = vmatprep.subr.mxu1 %v2036_v0  ;;  %1645 = vmatprep.subr.mxu0 %v2036_v0  ;;  %v852_v51 = vld [vmem:[#allocation8 + $0x28] sm:$0xff]  ;;  %v851_v57 = vld [vmem:[#allocation8 + $0x20] sm:$0xff]  ;;  %s1458_s30 = sshll.u32 %s283_s14, 4  ;;  %s1456_s26 = scalar_lea.hbm %s2387_s5, %s1592_s11  ;;  %s1459_s30 = int_to_ptr.vmem [resolvable:$true] %s1458_s30 }
  0x6b   : > { %1657 = vmatpush3.msra.mxu1 %v369_v5  ;;  %1646 = vmatpush3.msra.mxu0 %v286_v6  ;;  %s1445_s13 = scalar_lea.sflag [#allocation4], %s2201_s23  ;;  %s1956_s15 = scalar_lea.vmem %s1459_s30, 128 }
  0x6c   : > { %1658 = vmatprep.subr.mxu1 %v2036_v0  ;;  %1647 = vmatprep.subr.mxu0 %v2036_v0  ;;  %p1957_p4 = scmp.ne.s32.totalorder %s1459_s30, %s1956_s15  ;;  %p2405_p6 = scmp.ne.s32.totalorder %s2397_s7, 0 }
  0x6d   : > { %1659 = vmatpush3.msra.mxu1 %v368_v7  ;;  %1648 = vmatpush3.msra.mxu0 %v285_v8  ;;  %v1096_v8 = vld [vmem:[#allocation8 + $0x58] sm:$0xff]  ;;  %s2044_s22 = smov [#allocation10]  }
  0x6e   : > { %1661 = vmatmul.mubr.msk.f32.vlgmr.msra.gmra.mxu1 %vm294_vm1, %v2232_v9  ;;  %1650 = vmatmul.mubr.msk.f32.vlgmr.msra.gmra.mxu0 %vm294_vm1, %v2232_v9  ;;  %p1958_p12 = pnand %p1957_p4, %p2405_p6  ;;  %s1960_s27 = sshll.u32 %s2044_s22, 4  ;;  %s1961_s27 = int_to_ptr.vmem [resolvable:$false] %s1960_s27 }
  0x6f   : > { %1663 = vmatprep.subr.mxu1 %v2036_v0  ;;  %1665 = vmatprep.mubr.msk.f32.mxu1 %vm2037_vm0, %v2036_v0  ;;  %p1963_p5 = scmp.lt.s32.totalorder %s1459_s30, %s1961_s27 }
  0x70   : > { %1673 = vmatprep.subr.mxu0 %v2036_v0  ;;  %1681 = vmatprep.mubr.msk.f32.mxu0 %vm2037_vm0, %v2036_v0  ;;  %p1959_p0 = pneg %p1958_p12 }
  0x71   : > { %1674 = vmatpush3.msra.mxu0 %v612_v27 }
  0x72   : > { %1675 = vmatprep.subr.mxu0 %v2036_v0 }
  0x73   : > { %1676 = vmatpush3.msra.mxu0 %v611_v28 }
  0x74   : > { %1677 = vmatprep.subr.mxu0 %v2036_v0 }
  0x75   : > { %1678 = vmatpush3.msra.mxu0 %v610_v29 }
  0x76   : > { %1679 = vmatprep.subr.mxu0 %v2036_v0 }
  0x77   : > { %1680 = vmatpush3.msra.mxu0 %v609_v35 }
  0x78   : > { %1694 = vmatprep.subr.mxu0 %v2036_v0 }
 0x12e   : > { %v443_v12 = vpop.f32.mrf.mxu1  ;;  %v364_v13 = vpop.f32.mrf.mxu0 }
 0x12f   : > { %v2252_v14 = vadd.f32 %v1573_v10, %v443_v12  ;;  %v2254_v15 = vadd.f32 %v1571_v11, %v364_v13  ;;  %v1095_v10 = vld [vmem:[#allocation8 + $0x50] sm:$0xff]  ;;  %v1094_v11 = vld [vmem:[#allocation8 + $0x48] sm:$0xff] }
 0x130   : > { %v1662_v16 = vpop.f32.mrf.mxu1  ;;  %v1651_v17 = vpop.f32.mrf.mxu0 }
 0x131   : > { %689 = vrot.lane.b32.xlu1 %v2252_v14, %s2038_s16  ;;  %1664 = vmatpush3.xpose.msk.msra.mxu1 %vm447_vm2, %v2252_v14  ;;  %v1093_v17 = vld [vmem:[#allocation8 + $0x40] sm:$0xff] }
 0x132   : > { %1668 = vmatprep.subr.mxu1 %v2036_v0 }
 0x134   : > { %1666 = vmatmul.mubr.msk.f32.vlgmr.msra.gmra.mxu1 %vm447_vm2, %v2254_v15 }
 0x135   : > { %687 = vrot.lane.b32.xlu1 %v2254_v15, %s2038_s16  ;;  %1669 = vmatpush3.msra.mxu1 %v2232_v9  ;;  %s1962_s16 = scalar_lea.vmem %s1961_s27, 256 }
 0x136   : > { %1670 = vmatprep.mubr.msk.f32.mxu1 %vm2037_vm0, %v2036_v0  ;;  %1684 = vmatprep.subr.mxu1 %v2036_v0  ;;  %p1964_p3 = scmp.lt.s32.totalorder %s1962_s16, %s1956_s15 }
 0x138   : > { %p1965_p7 = por %p1964_p3, %p1963_p5 }
 0x13a   : > { %p1966_p9 = pnand %p1965_p7, %p1959_p0 }
 0x1a3   : > { %v690_v32 = vpop.permute.xlu1 %689 }
 0x1a7   : > { %v688_v34 = vpop.permute.xlu1 %687 }
 0x1f4   : > { %v520_v18 = vpop.f32.mrf.mxu1 }
 0x1f5   : > { %v524_v19 = vmul.f32 0.35355338, %v520_v18 }
 0x1f6   : > { %v1667_v20 = vpop.f32.mrf.mxu1 }
 0x1f7   : > { %v525_v21 = vsel %vm447_vm2, %v524_v19, -inf }
 0x1f8   : > { %526 = vmax.xlane.f32.xlu0 %v525_v21 }
 0x281   : > { %v527_v22 = vpop.xlane.xlu0 %526 }
 0x282   : > { %v528_v23 = vsub.f32 %v524_v19, %v527_v22 }
 0x284   : > { %v529_v24 = vmul.f32 1.442695, %v528_v23 }
 0x286   : > { %1834 = vpow2.f32 %v529_v24 }
 0x293   : > { %v1835_v25 = vpop.eup %1834 }
 0x294   : > { %v531_v26 = vsel %vm447_vm2, %v1835_v25, 0.0 }
 0x295   : > { %532 = vadd.xlane.f32.xlu0 %v531_v26 }
 0x31e   : > { %v533_v30 = vpop.xlane.xlu0 %532 }
 0x31f   : > { %1836 = vrcp.f32 %v533_v30  ;;  %v1338_v30 = vld [vmem:[#allocation8 + $0x78] sm:$0xff] }
 0x32c   : > { %v1837_v31 = vpop.eup %1836 }
 0x32d   : > { %v535_v33 = vmul.f32 %v1837_v31, %v1835_v25  ;;  %v1337_v31 = vld [vmem:[#allocation8 + $0x70] sm:$0xff] }
 0x32f   : > { %1671 = vmatmul.mubr.msk.f32.vlgmr.msra.gmra.mxu1 %vm447_vm2, %v535_v33  ;;  %v1336_v33 = vld [vmem:[#allocation8 + $0x68] sm:$0xff] }
 0x330   : > { %1685 = vmatpush3.xpose.msk.msra.mxu1 %vm447_vm2, %v690_v32  ;;  %1686 = vmatprep.mubr.msk.f32.mxu1 %vm2037_vm0, %v2036_v0 }
 0x331   : > { %1689 = vmatprep.subr.mxu1 %v2036_v0 }
 0x333   : > { %1687 = vmatmul.mubr.msk.f32.vlgmr.msra.gmra.mxu1 %vm447_vm2, %v688_v34 }
 0x334   : > { %1690 = vmatpush3.msra.mxu1 %v2232_v9  ;;  %1691 = vmatprep.mubr.msk.f32.mxu1 %vm2037_vm0, %v2036_v0 }
 0x335   : > { %1705 = vmatprep.subr.mxu1 %v2036_v0 }
 0x3ef   : > { %v605_v36 = vpop.f32.mrf.mxu1 }
 0x3f0   : > { %1682 = vmatmul.mubr.msk.f32.vlgmr.msra.gmra.mxu0 %vm294_vm1, %v605_v36 }
 0x3f1   : > { %v1672_v37 = vpop.f32.mrf.mxu1  ;;  %1702 = vmatprep.mubr.msk.f32.mxu0 %vm2037_vm0, %v2036_v0  ;;  %1695 = vmatpush3.msra.mxu0 %v854_v49 }
 0x3f2   : > { %1696 = vmatprep.subr.mxu0 %v2036_v0 }
 0x3f3   : > { %v761_v38 = vpop.f32.mrf.mxu1  ;;  %1697 = vmatpush3.msra.mxu0 %v853_v50 }
 0x3f4   : > { %v765_v39 = vmul.f32 0.35355338, %v761_v38  ;;  %1698 = vmatprep.subr.mxu0 %v2036_v0 }
 0x3f5   : > { %v1688_v40 = vpop.f32.mrf.mxu1  ;;  %1699 = vmatpush3.msra.mxu0 %v852_v51 }
 0x3f6   : > { %v766_v41 = vsel %vm447_vm2, %v765_v39, -inf  ;;  %1700 = vmatprep.subr.mxu0 %v2036_v0 }
 0x3f7   : > { %767 = vmax.xlane.f32.xlu0 %v766_v41  ;;  %1701 = vmatpush3.msra.mxu0 %v851_v57 }
 0x3f8   : > { %1715 = vmatprep.subr.mxu0 %v2036_v0 }
 0x40d   : > { %931 = vrot.lane.b32.xlu0 %v2252_v14, %s2039_s17 }
 0x411   : > { %929 = vrot.lane.b32.xlu0 %v2254_v15, %s2039_s17 }
 0x480   : > { %v768_v42 = vpop.xlane.xlu0 %767 }
 0x481   : > { %v769_v43 = vsub.f32 %v765_v39, %v768_v42  ;;  %v1335_v39 = vld [vmem:[#allocation8 + $0x60] sm:$0xff] }
 0x483   : > { %v770_v44 = vmul.f32 1.442695, %v769_v43 }
 0x484   : > { %v932_v54 = vpop.permute.xlu0 %931 }
 0x485   : > { %1838 = vpow2.f32 %v770_v44 }
 0x488   : > { %v930_v56 = vpop.permute.xlu0 %929 }
 0x492   : > { %v1839_v45 = vpop.eup %1838 }
 0x493   : > { %v772_v46 = vsel %vm447_vm2, %v1839_v45, 0.0 }
 0x494   : > { %773 = vadd.xlane.f32.xlu1 %v772_v46 }
 0x4a5   : > { %1173 = vrot.lane.b32.xlu1 %v2252_v14, %s2040_s12 }
 0x4b0   : > { %v2292_v47 = vpop.f32.mrf.mxu0 }
 0x4b1   : > { %v686_v50 = vmax.f32 %v2292_v47, 0.0 }
 0x4b2   : > { %v1683_v48 = vpop.f32.mrf.mxu0 }
 0x51d   : > { %v774_v52 = vpop.xlane.xlu1 %773 }
 0x51e   : > { %1840 = vrcp.f32 %v774_v52 }
 0x521   : > { %v1174_v12 = vpop.permute.xlu1 %1173 }
 0x52b   : > { %v1841_v53 = vpop.eup %1840 }
 0x52c   : > { %v776_v55 = vmul.f32 %v1841_v53, %v1839_v45 }
 0x52e   : > { %1692 = vmatmul.mubr.msk.f32.vlgmr.msra.gmra.mxu1 %vm447_vm2, %v776_v55 }
 0x52f   : > { %1706 = vmatpush3.xpose.msk.msra.mxu1 %vm447_vm2, %v932_v54  ;;  %1707 = vmatprep.mubr.msk.f32.mxu1 %vm2037_vm0, %v2036_v0 }
 0x530   : > { %1710 = vmatprep.subr.mxu1 %v2036_v0 }
 0x532   : > { %1708 = vmatmul.mubr.msk.f32.vlgmr.msra.gmra.mxu1 %vm447_vm2, %v930_v56 }
 0x533   : > { %1711 = vmatpush3.msra.mxu1 %v2232_v9  ;;  %1712 = vmatprep.mubr.msk.f32.mxu1 %vm2037_vm0, %v2036_v0 }
 0x534   : > { %1726 = vmatprep.subr.mxu1 %v2036_v0 }
 0x5ee   : > { %v846_v58 = vpop.f32.mrf.mxu1 }
 0x5ef   : > { %1703 = vmatmul.mubr.msk.f32.vlgmr.msra.gmra.mxu0 %vm294_vm1, %v846_v58 }
 0x5f0   : > { %v1693_v59 = vpop.f32.mrf.mxu1  ;;  %1723 = vmatprep.mubr.msk.f32.mxu0 %vm2037_vm0, %v2036_v0  ;;  %1716 = vmatpush3.msra.mxu0 %v1096_v8 }
 0x5f1   : > { %1717 = vmatprep.subr.mxu0 %v2036_v0 }
 0x5f2   : > { %v1003_v60 = vpop.f32.mrf.mxu1  ;;  %1718 = vmatpush3.msra.mxu0 %v1095_v10 }
 0x5f3   : > { %v1007_v61 = vmul.f32 0.35355338, %v1003_v60  ;;  %1719 = vmatprep.subr.mxu0 %v2036_v0 }
 0x5f4   : > { %v1709_v62 = vpop.f32.mrf.mxu1  ;;  %1720 = vmatpush3.msra.mxu0 %v1094_v11 }
 0x5f5   : > { %v1008_v63 = vsel %vm447_vm2, %v1007_v61, -inf  ;;  %1721 = vmatprep.subr.mxu0 %v2036_v0 }
 0x5f6   : > { %1009 = vmax.xlane.f32.xlu0 %v1008_v63  ;;  %1722 = vmatpush3.msra.mxu0 %v1093_v17 }
 0x5f7   : > { %1736 = vmatprep.subr.mxu0 %v2036_v0 }
 0x67f   : > { %v1010_v1 = vpop.xlane.xlu0 %1009 }
 0x680   : > { %v1011_v2 = vsub.f32 %v1007_v61, %v1010_v1 }
 0x682   : > { %v1012_v3 = vmul.f32 1.442695, %v1011_v2 }
 0x684   : > { %1842 = vpow2.f32 %v1012_v3 }
 0x691   : > { %v1843_v4 = vpop.eup %1842 }
 0x692   : > { %v1014_v5 = vsel %vm447_vm2, %v1843_v4, 0.0 }
 0x693   : > { %1015 = vadd.xlane.f32.xlu1 %v1014_v5 }
 0x6a4   : > { %1171 = vrot.lane.b32.xlu1 %v2254_v15, %s2040_s12 }
 0x6af   : > { %v924_v6 = vpop.f32.mrf.mxu0 }
 0x6b0   : > { %v928_v24 = vmax.f32 %v924_v6, 0.0 }
 0x6b1   : > { %v1704_v7 = vpop.f32.mrf.mxu0 }
 0x71c   : > { %v1016_v13 = vpop.xlane.xlu1 %1015 }
 0x71d   : > { %1844 = vrcp.f32 %v1016_v13 }
 0x720   : > { %v1172_v15 = vpop.permute.xlu1 %1171 }
 0x72a   : > { %v1845_v14 = vpop.eup %1844 }
 0x72b   : > { %v1018_v16 = vmul.f32 %v1845_v14, %v1843_v4 }
 0x72d   : > { %1713 = vmatmul.mubr.msk.f32.vlgmr.msra.gmra.mxu1 %vm447_vm2, %v1018_v16 }
 0x72e   : > { %1727 = vmatpush3.xpose.msk.msra.mxu1 %vm447_vm2, %v1174_v12  ;;  %1728 = vmatprep.mubr.msk.f32.mxu1 %vm2037_vm0, %v2036_v0 }
 0x72f   : > { %1731 = vmatprep.subr.mxu1 %v2036_v0 }
 0x731   : > { %1729 = vmatmul.mubr.msk.f32.vlgmr.msra.gmra.mxu1 %vm447_vm2, %v1172_v15 }
 0x732   : > { %1732 = vmatpush3.msra.mxu1 %v2232_v9  ;;  %1733 = vmatprep.mubr.msk.f32.mxu1 %vm2037_vm0, %v2036_v0 }
 0x7ed   : > { %v1088_v18 = vpop.f32.mrf.mxu1 }
 0x7ee   : > { %1724 = vmatmul.mubr.msk.f32.vlgmr.msra.gmra.mxu0 %vm294_vm1, %v1088_v18 }
 0x7ef   : > { %v1714_v19 = vpop.f32.mrf.mxu1  ;;  %1744 = vmatprep.mubr.msk.f32.mxu0 %vm2037_vm0, %v2036_v0  ;;  %1737 = vmatpush3.msra.mxu0 %v1338_v30 }
 0x7f0   : > { %1738 = vmatprep.subr.mxu0 %v2036_v0 }
 0x7f1   : > { %v1245_v20 = vpop.f32.mrf.mxu1  ;;  %1739 = vmatpush3.msra.mxu0 %v1337_v31 }
 0x7f2   : > { %v1249_v21 = vmul.f32 0.35355338, %v1245_v20  ;;  %1740 = vmatprep.subr.mxu0 %v2036_v0 }
 0x7f3   : > { %v1730_v22 = vpop.f32.mrf.mxu1  ;;  %1741 = vmatpush3.msra.mxu0 %v1336_v33 }
 0x7f4   : > { %v1250_v23 = vsel %vm447_vm2, %v1249_v21, -inf  ;;  %1742 = vmatprep.subr.mxu0 %v2036_v0 }
 0x7f5   : > { %1251 = vmax.xlane.f32.xlu0 %v1250_v23  ;;  %1743 = vmatpush3.msra.mxu0 %v1335_v39 }
 0x80b   : > { %1414 = vrot.lane.b32.xlu0 %v928_v24, %s2041_s8 }
 0x80f   : > { %1430 = vrot.lane.b32.xlu0 %v2232_v9, %s2041_s8 }
 0x813   : > { %1433 = vrot.lane.b32.xlu0 %v2232_v9, %s2042_s10 }
 0x87e   : > { %v1252_v25 = vpop.xlane.xlu0 %1251 }
 0x87f   : > { %v1253_v26 = vsub.f32 %v1249_v21, %v1252_v25 }
 0x881   : > { %v1254_v27 = vmul.f32 1.442695, %v1253_v26 }
 0x882   : > { %v1415_v44 = vpop.permute.xlu0 %1414 }
 0x883   : > { %1846 = vpow2.f32 %v1254_v27  ;;  %v1425_v53 = vsel %vm294_vm1, %v686_v50, %v1415_v44 }
 0x886   : > { %v1431_v45 = vpop.permute.xlu0 %1430 }
 0x887   : > { %v1439_v49 = vsel %vm294_vm1, %v2232_v9, %v1431_v45 }
 0x88a   : > { %v1434_v46 = vpop.permute.xlu0 %1433 }
 0x88b   : > { %v1440_v51 = vsel %vm1426_vm3, %v1439_v49, %v1434_v46 }
 0x890   : > { %v1847_v28 = vpop.eup %1846 }
 0x891   : > { %v1256_v29 = vsel %vm447_vm2, %v1847_v28, 0.0 }
 0x892   : > { %1257 = vadd.xlane.f32.xlu1 %v1256_v29 }
 0x8ae   : > { %v1166_v32 = vpop.f32.mrf.mxu0 }
 0x8af   : > { %v1170_v34 = vmax.f32 %v1166_v32, 0.0 }
 0x8b0   : > { %v1725_v35 = vpop.f32.mrf.mxu0 }
 0x8b1   : > { %1418 = vrot.lane.b32.xlu0 %v1170_v34, %s2042_s10 }
 0x8b5   : > { %1436 = vrot.lane.b32.xlu0 %v2232_v9, %s2043_s9 }
 0x91b   : > { %v1258_v36 = vpop.xlane.xlu1 %1257 }
 0x91c   : > { %1848 = vrcp.f32 %v1258_v36 }
 0x923   : > { %v1419_v48 = vpop.permute.xlu0 %1418 }
 0x924   : > { %v1427_v54 = vsel %vm1426_vm3, %v1425_v53, %v1419_v48 }
 0x927   : > { %v1437_v52 = vpop.permute.xlu0 %1436 }
 0x928   : > { %v1441_v56 = vsel %vm1428_vm4, %v1440_v51, %v1437_v52 }
 0x929   : > { %v1849_v37 = vpop.eup %1848 }
 0x92a   : > { %v1260_v38 = vmul.f32 %v1849_v37, %v1847_v28 }
 0x92c   : > { %1734 = vmatmul.mubr.msk.f32.vlgmr.msra.gmra.mxu1 %vm447_vm2, %v1260_v38 }
 0x9ec   : > { %v1330_v40 = vpop.f32.mrf.mxu1 }
 0x9ed   : > { %1745 = vmatmul.mubr.msk.f32.vlgmr.msra.gmra.mxu0 %vm294_vm1, %v1330_v40 }
 0x9ee   : > { %v1735_v41 = vpop.f32.mrf.mxu1 }
 0xaad   : > { %v1408_v42 = vpop.f32.mrf.mxu0 }
 0xaae   : > { %v1412_v43 = vmax.f32 %v1408_v42, 0.0 }
 0xaaf   : > { %v1746_v0 = vpop.f32.mrf.mxu0 }
 0xab0   : > { %1422 = vrot.lane.b32.xlu1 %v1412_v43, %s2043_s9 }
 0xb22   : > { %v1423_v55 = vpop.permute.xlu1 %1422 }
 0xb23   : > { %v1429_v57 = vsel %vm1428_vm4, %v1427_v54, %v1423_v55 }
 0xb24   : > { %v1442_v58 = vadd.f32 %v1441_v56, %v1429_v57 }
 0xb26   : > { %1443 = vst [vmem:[%s283_s14] sm:$0xff] %v1442_v58 }
 0xb27   : > { %1969 = shalt.err (!%p1966_p9)
}
 0xb28   : > { %s1970_s17 = scalar_lea.hbm %s1456_s26, 128  ;;  %s1974_s8 = scalar_lea.hbm %s2387_s5, 256 }
 0xb29   : > { %p1971_p13 = scmp.ne.s32.totalorder %s1456_s26, %s1970_s17  ;;  %p1975_p11 = scmp.lt.s32.totalorder %s1456_s26, %s2387_s5 }
 0xb2a   : > { %p1976_p1 = scmp.lt.s32.totalorder %s1974_s8, %s1970_s17 }
 0xb2b   : > { %p1972_p8 = pnand %p1971_p13, %p2405_p6 }
 0xb2c   : > { %p1977_p2 = por %p1976_p1, %p1975_p11 }
 0xb2d   : > { %p1973_p10 = pneg %p1972_p8 }
 0xb2f   : > { %p1978_p4 = pnand %p1977_p2, %p1973_p10 }
 0xb31   : > { %1981 = shalt.err (!%p1978_p4)
}
 0xb32   : > { %1761 = dma.vmem_to_hbm [thread:$0]  (%p2405_p6), %s1459_s30, 128, %s1456_s26, %s1445_s13  }
 0xb33 PF: > { %s1470_s11 = sand.u32 1, %s2016_s18   ;;  %p2406_p12 = scmp.ne.s32.totalorder %s2393_s25, 0 }
 0xb34   : > { %p2407_p0 = scmp.ge.s32.totalorder %s2028_s21, 2  ;;  %s1471_s14 = scalar_lea.sflag [#allocation4], %s1470_s11 }
 0xb36   : > { %p1778_p5 = pnand %p2407_p0, %p2406_p12 }
 0xb38   : > { %p1779_p3 = pneg %p1778_p5 }
 0xb3a   : > { %2011 = dma.done.wait (%p1779_p3), %s1471_s14, 128  }
 0xb3b   : > { %2013 = vsyncadd (%p1779_p3), %s1471_s14, 4294967168  ;;  %p20_p7 = scmp.ge.s32.totalorder %s2155_s28, 4   ;;  %s2408_s18 = smov %s2020_s19 }
 0xb3c   : > { %s2409_s19 = smov %s2024_s20  ;;  %s2410_s20 = smov %s2165_s6 }
 0xb3d   : > { %s2411_s21 = smov %s2155_s28  ;;  %22 = sbr.rel (!%p20_p7) target bundleno = 7 (0x7), region = 100 }
 0xb42   :  { %1476 = vsyncpa [#allocation3], 1 }
 0xb43   :  { %1478 = vsyncpa [#allocation3 + $0x1], 1 }
 0xb44   :  { %1479 = vsyncpa [#allocation6], 1 }
 0xb45   :  { %1480 = vsyncpa [#allocation9], 1 }
 0xb46   :  { %1481 = vsyncpa [#allocation4], 1 }
 0xb47   :  { %1483 = vsyncpa [#allocation4 + $0x1], 1 }

</bundles_post_ra>
